<compile_context>
chip_gen: v6e
topology: v6e:2x2x1
jax: 0.10.0
libtpu: 0.0.40
codegen_flags: <defaults>
</compile_context>

<pallas_src>
import math
import functools

import jax
import jax.numpy as jnp
from jax import lax
from jax.experimental import pallas as pl
from jax.experimental.pallas import tpu as pltpu


# ----------------------------------------------------------------------------
# Kernel
# ----------------------------------------------------------------------------
def _layer_norm_f32(z, gamma, beta, eps=1e-12):
    # biased variance, eps inside sqrt, rsqrt on the EUP (frees VALU slots)
    u = jnp.mean(z, axis=-1, keepdims=True)
    s = jnp.mean((z - u) ** 2, axis=-1, keepdims=True)
    return gamma * ((z - u) * lax.rsqrt(s + eps)) + beta


def _encoder_layer_kernel(x_ref, mask_ref,
                          wq_ref, bq_ref, wk_ref, bk_ref, wv_ref, bv_ref,
                          fwr_ref, fwi_ref,
                          cr_ref, ci_ref, ar_ref, ai_ref,
                          g1_ref, b1_ref, g2_ref, b2_ref,
                          o_ref, *, num_heads, head_dim):
    # x_ref: (1, S, H)  mask_ref: (1, S, S)  weights: full blocks (f32)
    x = x_ref[0]                      # [S, H]
    mask = mask_ref[0]                # [S, S] additive mask

    # --- QKV projections (no redundant dtype casts; everything is f32) ---
    q = jnp.dot(x, wq_ref[...], preferred_element_type=jnp.float32) + bq_ref[...]
    k = jnp.dot(x, wk_ref[...], preferred_element_type=jnp.float32) + bk_ref[...]
    v = jnp.dot(x, wv_ref[...], preferred_element_type=jnp.float32) + bv_ref[...]

    inv_sqrt_dh = 1.0 / math.sqrt(head_dim)
    ctx_heads = []
    for h in range(num_heads):        # static, fully unrolled (num_heads small)
        sl = slice(h * head_dim, (h + 1) * head_dim)
        qh, kh, vh = q[:, sl], k[:, sl], v[:, sl]
        scores = jnp.dot(qh, kh.T, preferred_element_type=jnp.float32)
        scores = scores * inv_sqrt_dh + mask
        m = jnp.max(scores, axis=-1, keepdims=True)
        e = jnp.exp(scores - m)
        p = e / jnp.sum(e, axis=-1, keepdims=True)     # attn dropout = identity (eval)
        ctx_heads.append(jnp.dot(p, vh, preferred_element_type=jnp.float32))
    ctx = jnp.concatenate(ctx_heads, axis=-1)          # [S, H]

    # --- FilterLayer: rfft(hidden) * complex_weight -> irfft, as DFT matmuls ---
    xr = jnp.dot(ctx, cr_ref[...], preferred_element_type=jnp.float32)   # [S, F]
    xi = jnp.dot(ctx, ci_ref[...], preferred_element_type=jnp.float32)   # [S, F]
    wr = fwr_ref[...]
    wi = fwi_ref[...]
    yr = xr * wr - xi * wi
    yi = xr * wi + xi * wr
    filt = (jnp.dot(yr, ar_ref[...], preferred_element_type=jnp.float32)
            + jnp.dot(yi, ai_ref[...], preferred_element_type=jnp.float32))  # [S, H]

    # out dropout = identity (eval); residual + LayerNorm (filter's LN)
    h1 = _layer_norm_f32(filt + ctx, g1_ref[...], b1_ref[...])
    # residual with layer input + final LayerNorm
    h2 = _layer_norm_f32(h1 + x, g2_ref[...], b2_ref[...])

    o_ref[0] = h2.astype(o_ref.dtype)


# ----------------------------------------------------------------------------
# Wrappers
# ----------------------------------------------------------------------------
def make_dft_matrices(hidden):
    """Extract the exact linear maps used by jnp.fft.rfft / irfft (ortho norm)."""
    f = hidden // 2 + 1
    eye_h = jnp.eye(hidden, dtype=jnp.float32)
    fwd = jnp.fft.rfft(eye_h, axis=-1, norm='ortho')                    # [H, F] complex
    cr = jnp.real(fwd).astype(jnp.float32)
    ci = jnp.imag(fwd).astype(jnp.float32)
    eye_f = jnp.eye(f, dtype=jnp.complex64)
    ar = jnp.fft.irfft(eye_f, n=hidden, axis=-1, norm='ortho').astype(jnp.float32)        # [F, H]
    ai = jnp.fft.irfft(1j * eye_f, n=hidden, axis=-1, norm='ortho').astype(jnp.float32)   # [F, H]
    return cr, ci, ar, ai


def encoder_layer(x, mask, params, dft, *, num_heads):
    B, S, H = x.shape
    F = H // 2 + 1
    head_dim = H // num_heads
    cr, ci, ar, ai = dft
    (wq, bq, wk, bk, wv, bv, fwr, fwi, g1, b1, g2, b2) = params

    kernel = functools.partial(_encoder_layer_kernel,
                               num_heads=num_heads, head_dim=head_dim)

    flops_per_batch = (3 * 2 * S * H * H                 # qkv projections
                       + num_heads * 4 * S * S * head_dim  # scores + context
                       + 4 * 2 * S * H * F)              # forward/backward DFT
    cost = pl.CostEstimate(
        flops=int(B * flops_per_batch),
        transcendentals=int(B * num_heads * S * S),       # softmax exp
        bytes_accessed=int(4 * (2 * B * S * H + B * S * S + 3 * H * H
                                + 2 * S * F + 4 * H * F + 8 * H)),
    )

    def full(shape):
        return pl.BlockSpec(shape, lambda b, _n=len(shape): (0,) * _n)

    grid_spec = pltpu.PrefetchScalarGridSpec(
        num_scalar_prefetch=0,
        grid=(B,),
        in_specs=[
            pl.BlockSpec((1, S, H), lambda b: (b, 0, 0)),   # x (one batch slab)
            pl.BlockSpec((1, S, S), lambda b: (b, 0, 0)),   # additive mask
            full((H, H)), full((1, H)),                     # wq, bq
            full((H, H)), full((1, H)),                     # wk, bk
            full((H, H)), full((1, H)),                     # wv, bv
            full((S, F)), full((S, F)),                     # filter weight (re, im)
            full((H, F)), full((H, F)),                     # rfft matrices (re, im)
            full((F, H)), full((F, H)),                     # irfft matrices (re, im)
            full((1, H)), full((1, H)),                     # LN1 gamma, beta
            full((1, H)), full((1, H)),                     # LN2 gamma, beta
        ],
        out_specs=pl.BlockSpec((1, S, H), lambda b: (b, 0, 0)),
    )

    return pl.pallas_call(
        kernel,
        out_shape=jax.ShapeDtypeStruct((B, S, H), x.dtype),
        grid_spec=grid_spec,
        compiler_params=pltpu.CompilerParams(
            dimension_semantics=("parallel",)),            # batch axis -> both TCs on v7x
        cost_estimate=cost,
    )(x, mask,
      wq, bq.reshape(1, H), wk, bk.reshape(1, H), wv, bv.reshape(1, H),
      fwr, fwi, cr, ci, ar, ai,
      g1.reshape(1, H), b1.reshape(1, H), g2.reshape(1, H), b2.reshape(1, H))


def encoder_forward(x, mask, layer_params, dft, *, num_heads,
                    output_all_encoded_layers=True):
    all_encoder_layers = []
    h = x
    for params in layer_params:
        h = encoder_layer(h, mask, params, dft, num_heads=num_heads)
        if output_all_encoded_layers:
            all_encoder_layers.append(h)
    if not output_all_encoded_layers:
        all_encoder_layers.append(h)
    return all_encoder_layers


# ----------------------------------------------------------------------------
# Pure-JAX reference (mirrors the PyTorch forward, eval mode, flags off)
# ----------------------------------------------------------------------------
def _reference_layer(x, mask, params, *, num_heads):
    wq, bq, wk, bk, wv, bv, fwr, fwi, g1, b1, g2, b2 = params
    B, S, H = x.shape
    dh = H // num_heads

    def ln(z, g, b, eps=1e-12):
        u = z.mean(-1, keepdims=True)
        s = ((z - u) ** 2).mean(-1, keepdims=True)
        return g * (z - u) / jnp.sqrt(s + eps) + b

    q = x @ wq + bq
    k = x @ wk + bk
    v = x @ wv + bv

    def split(t):
        return t.reshape(B, S, num_heads, dh).transpose(0, 2, 1, 3)

    qh, kh, vh = split(q), split(k), split(v)
    scores = jnp.einsum('bhqd,bhkd->bhqk', qh, kh) / math.sqrt(dh)
    scores = scores + mask[:, None, :, :]
    probs = jax.nn.softmax(scores, axis=-1)
    ctx = jnp.einsum('bhqk,bhkd->bhqd', probs, vh)
    ctx = ctx.transpose(0, 2, 1, 3).reshape(B, S, H)

    xf = jnp.fft.rfft(ctx, axis=-1, norm='ortho')
    xf = xf * (fwr + 1j * fwi)[None]
    filt = jnp.fft.irfft(xf, n=H, axis=-1, norm='ortho')

    h1 = ln(filt + ctx, g1, b1)
    h2 = ln(h1 + x, g2, b2)
    return h2


# ----------------------------------------------------------------------------
if __name__ == "__main__":
    B, S, H = 2, 8, 32          # batch, max_seq_length, hidden_size
    num_heads = 2               # num_attention_heads
    num_layers = 2              # num_hidden_layers
    F = H // 2 + 1

    key = jax.random.PRNGKey(0)
    kx, kp = jax.random.split(key, 2)
    x = jax.random.normal(kx, (B, S, H), dtype=jnp.float32)

    # additive attention mask (mask out last 2 key positions for batch 1)
    key_mask = jnp.ones((B, S), jnp.float32)
    key_mask = key_mask.at[1, S - 2:].set(0.0)
    mask = jnp.broadcast_to((1.0 - key_mask)[:, None, :] * -10000.0, (B, S, S))

    def init_layer(k):
        ks = jax.random.split(k, 8)
        lim = 1.0 / math.sqrt(H)
        wq = jax.random.uniform(ks[0], (H, H), minval=-lim, maxval=lim, dtype=jnp.float32)
        bq = jax.random.uniform(ks[1], (H,), minval=-lim, maxval=lim, dtype=jnp.float32)
        wk = jax.random.uniform(ks[2], (H, H), minval=-lim, maxval=lim, dtype=jnp.float32)
        bk = jax.random.uniform(ks[3], (H,), minval=-lim, maxval=lim, dtype=jnp.float32)
        wv = jax.random.uniform(ks[4], (H, H), minval=-lim, maxval=lim, dtype=jnp.float32)
        bv = jax.random.uniform(ks[5], (H,), minval=-lim, maxval=lim, dtype=jnp.float32)
        fwr = 0.02 * jax.random.normal(ks[6], (S, F), dtype=jnp.float32)
        fwi = 0.02 * jax.random.normal(ks[7], (S, F), dtype=jnp.float32)
        g1 = jnp.ones((H,), jnp.float32); b1 = jnp.zeros((H,), jnp.float32)
        g2 = jnp.ones((H,), jnp.float32); b2 = jnp.zeros((H,), jnp.float32)
        return (wq, bq, wk, bk, wv, bv, fwr, fwi, g1, b1, g2, b2)

    layer_params = [init_layer(k) for k in jax.random.split(kp, num_layers)]
    dft = make_dft_matrices(H)

    outs = encoder_forward(x, mask, layer_params, dft, num_heads=num_heads,
                           output_all_encoded_layers=True)
    outs = [jax.block_until_ready(o) for o in outs]

    # pure-JAX reference of the full Encoder stack
    h = x
    refs = []
    for params in layer_params:
        h = _reference_layer(h, mask, params, num_heads=num_heads)
        refs.append(h)

    for o, r in zip(outs, refs):
        assert o.shape == (B, S, H)
        err = float(jnp.max(jnp.abs(o - r)))
        assert jnp.allclose(o, r, atol=1e-3, rtol=1e-3), f"mismatch vs reference: {err}"

    print("KERNEL_OK")
</pallas_src>

<mosaic_0001>
module attributes {stable_mosaic.version = 11 : i64} {
  func.func @_encoder_layer_kernel(%arg0: i32, %arg1: memref<1x8x32xf32, #tpu.memory_space<vmem>>, %arg2: memref<1x8x8xf32, #tpu.memory_space<vmem>>, %arg3: memref<32x32xf32, #tpu.memory_space<vmem>>, %arg4: memref<1x32xf32, #tpu.memory_space<vmem>>, %arg5: memref<32x32xf32, #tpu.memory_space<vmem>>, %arg6: memref<1x32xf32, #tpu.memory_space<vmem>>, %arg7: memref<32x32xf32, #tpu.memory_space<vmem>>, %arg8: memref<1x32xf32, #tpu.memory_space<vmem>>, %arg9: memref<8x17xf32, #tpu.memory_space<vmem>>, %arg10: memref<8x17xf32, #tpu.memory_space<vmem>>, %arg11: memref<32x17xf32, #tpu.memory_space<vmem>>, %arg12: memref<32x17xf32, #tpu.memory_space<vmem>>, %arg13: memref<17x32xf32, #tpu.memory_space<vmem>>, %arg14: memref<17x32xf32, #tpu.memory_space<vmem>>, %arg15: memref<1x32xf32, #tpu.memory_space<vmem>>, %arg16: memref<1x32xf32, #tpu.memory_space<vmem>>, %arg17: memref<1x32xf32, #tpu.memory_space<vmem>>, %arg18: memref<1x32xf32, #tpu.memory_space<vmem>>, %arg19: memref<1x8x32xf32, #tpu.memory_space<vmem>>) attributes {dimension_semantics = [#tpu.dimension_semantics<parallel>], iteration_bounds = array<i64: 2>, scalar_prefetch = 0 : i64, scratch_operands = 0 : i64, tpu.core_type = #tpu.core_type<tc>, window_params = [{transform_indices = @transform_0, window_bounds = array<i64: 1, 8, 32>}, {transform_indices = @transform_1, window_bounds = array<i64: 1, 8, 8>}, {pipeline_mode = #tpu.pipeline_mode<synchronous>, transform_indices = @transform_2, window_bounds = array<i64: 32, 32>}, {pipeline_mode = #tpu.pipeline_mode<synchronous>, transform_indices = @transform_3, window_bounds = array<i64: 1, 32>}, {pipeline_mode = #tpu.pipeline_mode<synchronous>, transform_indices = @transform_4, window_bounds = array<i64: 32, 32>}, {pipeline_mode = #tpu.pipeline_mode<synchronous>, transform_indices = @transform_5, window_bounds = array<i64: 1, 32>}, {pipeline_mode = #tpu.pipeline_mode<synchronous>, transform_indices = @transform_6, window_bounds = array<i64: 32, 32>}, {pipeline_mode = #tpu.pipeline_mode<synchronous>, transform_indices = @transform_7, window_bounds = array<i64: 1, 32>}, {pipeline_mode = #tpu.pipeline_mode<synchronous>, transform_indices = @transform_8, window_bounds = array<i64: 8, 17>}, {pipeline_mode = #tpu.pipeline_mode<synchronous>, transform_indices = @transform_9, window_bounds = array<i64: 8, 17>}, {pipeline_mode = #tpu.pipeline_mode<synchronous>, transform_indices = @transform_10, window_bounds = array<i64: 32, 17>}, {pipeline_mode = #tpu.pipeline_mode<synchronous>, transform_indices = @transform_11, window_bounds = array<i64: 32, 17>}, {pipeline_mode = #tpu.pipeline_mode<synchronous>, transform_indices = @transform_12, window_bounds = array<i64: 17, 32>}, {pipeline_mode = #tpu.pipeline_mode<synchronous>, transform_indices = @transform_13, window_bounds = array<i64: 17, 32>}, {pipeline_mode = #tpu.pipeline_mode<synchronous>, transform_indices = @transform_14, window_bounds = array<i64: 1, 32>}, {pipeline_mode = #tpu.pipeline_mode<synchronous>, transform_indices = @transform_15, window_bounds = array<i64: 1, 32>}, {pipeline_mode = #tpu.pipeline_mode<synchronous>, transform_indices = @transform_16, window_bounds = array<i64: 1, 32>}, {pipeline_mode = #tpu.pipeline_mode<synchronous>, transform_indices = @transform_17, window_bounds = array<i64: 1, 32>}, {transform_indices = @transform_18, window_bounds = array<i64: 1, 8, 32>}]} {
    %c0 = arith.constant 0 : index
    %c0_0 = arith.constant 0 : index
    %c0_1 = arith.constant 0 : index
    %0 = vector.load %arg1[%c0, %c0_0, %c0_1] : memref<1x8x32xf32, #tpu.memory_space<vmem>>, vector<1x8x32xf32>
    %1 = vector.shape_cast %0 : vector<1x8x32xf32> to vector<8x32xf32>
    %c0_2 = arith.constant 0 : index
    %c0_3 = arith.constant 0 : index
    %c0_4 = arith.constant 0 : index
    %2 = vector.load %arg2[%c0_2, %c0_3, %c0_4] : memref<1x8x8xf32, #tpu.memory_space<vmem>>, vector<1x8x8xf32>
    %3 = vector.shape_cast %2 : vector<1x8x8xf32> to vector<8x8xf32>
    %c0_5 = arith.constant 0 : index
    %c0_6 = arith.constant 0 : index
    %4 = vector.load %arg3[%c0_5, %c0_6] : memref<32x32xf32, #tpu.memory_space<vmem>>, vector<32x32xf32>
    %cst = arith.constant dense<0.000000e+00> : vector<8x32xf32>
    %5 = tpu.matmul %1, %4, %cst {dimension_numbers = #tpu.dot_dimension_numbers<[1], [0], [0], [1], [0, 0, 1, 1], [], []>} : vector<8x32xf32>, vector<32x32xf32>, vector<8x32xf32> -> vector<8x32xf32>
    %c0_7 = arith.constant 0 : index
    %c0_8 = arith.constant 0 : index
    %6 = vector.load %arg4[%c0_7, %c0_8] : memref<1x32xf32, #tpu.memory_space<vmem>>, vector<1x32xf32>
    %7 = vector.broadcast %6 : vector<1x32xf32> to vector<8x32xf32>
    %8 = arith.addf %5, %7 : vector<8x32xf32>
    %c0_9 = arith.constant 0 : index
    %c0_10 = arith.constant 0 : index
    %9 = vector.load %arg5[%c0_9, %c0_10] : memref<32x32xf32, #tpu.memory_space<vmem>>, vector<32x32xf32>
    %cst_11 = arith.constant dense<0.000000e+00> : vector<8x32xf32>
    %10 = tpu.matmul %1, %9, %cst_11 {dimension_numbers = #tpu.dot_dimension_numbers<[1], [0], [0], [1], [0, 0, 1, 1], [], []>} : vector<8x32xf32>, vector<32x32xf32>, vector<8x32xf32> -> vector<8x32xf32>
    %c0_12 = arith.constant 0 : index
    %c0_13 = arith.constant 0 : index
    %11 = vector.load %arg6[%c0_12, %c0_13] : memref<1x32xf32, #tpu.memory_space<vmem>>, vector<1x32xf32>
    %12 = vector.broadcast %11 : vector<1x32xf32> to vector<8x32xf32>
    %13 = arith.addf %10, %12 : vector<8x32xf32>
    %c0_14 = arith.constant 0 : index
    %c0_15 = arith.constant 0 : index
    %14 = vector.load %arg7[%c0_14, %c0_15] : memref<32x32xf32, #tpu.memory_space<vmem>>, vector<32x32xf32>
    %cst_16 = arith.constant dense<0.000000e+00> : vector<8x32xf32>
    %15 = tpu.matmul %1, %14, %cst_16 {dimension_numbers = #tpu.dot_dimension_numbers<[1], [0], [0], [1], [0, 0, 1, 1], [], []>} : vector<8x32xf32>, vector<32x32xf32>, vector<8x32xf32> -> vector<8x32xf32>
    %c0_17 = arith.constant 0 : index
    %c0_18 = arith.constant 0 : index
    %16 = vector.load %arg8[%c0_17, %c0_18] : memref<1x32xf32, #tpu.memory_space<vmem>>, vector<1x32xf32>
    %17 = vector.broadcast %16 : vector<1x32xf32> to vector<8x32xf32>
    %18 = arith.addf %15, %17 : vector<8x32xf32>
    %19 = vector.extract_strided_slice %8 {offsets = [0, 0], sizes = [8, 16], strides = [1, 1]} : vector<8x32xf32> to vector<8x16xf32>
    %20 = vector.extract_strided_slice %13 {offsets = [0, 0], sizes = [8, 16], strides = [1, 1]} : vector<8x32xf32> to vector<8x16xf32>
    %21 = vector.extract_strided_slice %18 {offsets = [0, 0], sizes = [8, 16], strides = [1, 1]} : vector<8x32xf32> to vector<8x16xf32>
    %22 = tpu.transpose %20, [1, 0] : vector<8x16xf32> -> vector<16x8xf32>
    %cst_19 = arith.constant dense<0.000000e+00> : vector<8x8xf32>
    %23 = tpu.matmul %19, %22, %cst_19 {dimension_numbers = #tpu.dot_dimension_numbers<[1], [0], [0], [1], [0, 0, 1, 1], [], []>} : vector<8x16xf32>, vector<16x8xf32>, vector<8x8xf32> -> vector<8x8xf32>
    %cst_20 = arith.constant 2.500000e-01 : f32
    %24 = vector.broadcast %cst_20 : f32 to vector<8x8xf32>
    %25 = arith.mulf %23, %24 : vector<8x8xf32>
    %26 = arith.addf %25, %3 : vector<8x8xf32>
    %cst_21 = arith.constant dense<0xFF800000> : vector<8xf32>
    %27 = vector.multi_reduction <maximumf>, %26, %cst_21 [1] : vector<8x8xf32> to vector<8xf32>
    %28 = vector.shape_cast %27 : vector<8xf32> to vector<8x1xf32>
    %29 = vector.broadcast %28 : vector<8x1xf32> to vector<8x8xf32>
    %30 = arith.subf %26, %29 : vector<8x8xf32>
    %31 = math.exp %30 : vector<8x8xf32>
    %cst_22 = arith.constant dense<0.000000e+00> : vector<8xf32>
    %32 = vector.multi_reduction <add>, %31, %cst_22 [1] : vector<8x8xf32> to vector<8xf32>
    %33 = vector.shape_cast %32 : vector<8xf32> to vector<8x1xf32>
    %34 = vector.broadcast %33 : vector<8x1xf32> to vector<8x8xf32>
    %35 = arith.divf %31, %34 : vector<8x8xf32>
    %cst_23 = arith.constant dense<0.000000e+00> : vector<8x16xf32>
    %36 = tpu.matmul %35, %21, %cst_23 {dimension_numbers = #tpu.dot_dimension_numbers<[1], [0], [0], [1], [0, 0, 1, 1], [], []>} : vector<8x8xf32>, vector<8x16xf32>, vector<8x16xf32> -> vector<8x16xf32>
    %37 = vector.extract_strided_slice %8 {offsets = [0, 16], sizes = [8, 16], strides = [1, 1]} : vector<8x32xf32> to vector<8x16xf32>
    %38 = vector.extract_strided_slice %13 {offsets = [0, 16], sizes = [8, 16], strides = [1, 1]} : vector<8x32xf32> to vector<8x16xf32>
    %39 = vector.extract_strided_slice %18 {offsets = [0, 16], sizes = [8, 16], strides = [1, 1]} : vector<8x32xf32> to vector<8x16xf32>
    %40 = tpu.transpose %38, [1, 0] : vector<8x16xf32> -> vector<16x8xf32>
    %cst_24 = arith.constant dense<0.000000e+00> : vector<8x8xf32>
    %41 = tpu.matmul %37, %40, %cst_24 {dimension_numbers = #tpu.dot_dimension_numbers<[1], [0], [0], [1], [0, 0, 1, 1], [], []>} : vector<8x16xf32>, vector<16x8xf32>, vector<8x8xf32> -> vector<8x8xf32>
    %cst_25 = arith.constant 2.500000e-01 : f32
    %42 = vector.broadcast %cst_25 : f32 to vector<8x8xf32>
    %43 = arith.mulf %41, %42 : vector<8x8xf32>
    %44 = arith.addf %43, %3 : vector<8x8xf32>
    %cst_26 = arith.constant dense<0xFF800000> : vector<8xf32>
    %45 = vector.multi_reduction <maximumf>, %44, %cst_26 [1] : vector<8x8xf32> to vector<8xf32>
    %46 = vector.shape_cast %45 : vector<8xf32> to vector<8x1xf32>
    %47 = vector.broadcast %46 : vector<8x1xf32> to vector<8x8xf32>
    %48 = arith.subf %44, %47 : vector<8x8xf32>
    %49 = math.exp %48 : vector<8x8xf32>
    %cst_27 = arith.constant dense<0.000000e+00> : vector<8xf32>
    %50 = vector.multi_reduction <add>, %49, %cst_27 [1] : vector<8x8xf32> to vector<8xf32>
    %51 = vector.shape_cast %50 : vector<8xf32> to vector<8x1xf32>
    %52 = vector.broadcast %51 : vector<8x1xf32> to vector<8x8xf32>
    %53 = arith.divf %49, %52 : vector<8x8xf32>
    %cst_28 = arith.constant dense<0.000000e+00> : vector<8x16xf32>
    %54 = tpu.matmul %53, %39, %cst_28 {dimension_numbers = #tpu.dot_dimension_numbers<[1], [0], [0], [1], [0, 0, 1, 1], [], []>} : vector<8x8xf32>, vector<8x16xf32>, vector<8x16xf32> -> vector<8x16xf32>
    %55 = tpu.concatenate %36, %54 in 1 : vector<8x16xf32>, vector<8x16xf32> -> vector<8x32xf32>
    %c0_29 = arith.constant 0 : index
    %c0_30 = arith.constant 0 : index
    %56 = vector.load %arg11[%c0_29, %c0_30] : memref<32x17xf32, #tpu.memory_space<vmem>>, vector<32x17xf32>
    %cst_31 = arith.constant dense<0.000000e+00> : vector<8x17xf32>
    %57 = tpu.matmul %55, %56, %cst_31 {dimension_numbers = #tpu.dot_dimension_numbers<[1], [0], [0], [1], [0, 0, 1, 1], [], []>} : vector<8x32xf32>, vector<32x17xf32>, vector<8x17xf32> -> vector<8x17xf32>
    %c0_32 = arith.constant 0 : index
    %c0_33 = arith.constant 0 : index
    %58 = vector.load %arg12[%c0_32, %c0_33] : memref<32x17xf32, #tpu.memory_space<vmem>>, vector<32x17xf32>
    %cst_34 = arith.constant dense<0.000000e+00> : vector<8x17xf32>
    %59 = tpu.matmul %55, %58, %cst_34 {dimension_numbers = #tpu.dot_dimension_numbers<[1], [0], [0], [1], [0, 0, 1, 1], [], []>} : vector<8x32xf32>, vector<32x17xf32>, vector<8x17xf32> -> vector<8x17xf32>
    %c0_35 = arith.constant 0 : index
    %c0_36 = arith.constant 0 : index
    %60 = vector.load %arg9[%c0_35, %c0_36] : memref<8x17xf32, #tpu.memory_space<vmem>>, vector<8x17xf32>
    %c0_37 = arith.constant 0 : index
    %c0_38 = arith.constant 0 : index
    %61 = vector.load %arg10[%c0_37, %c0_38] : memref<8x17xf32, #tpu.memory_space<vmem>>, vector<8x17xf32>
    %62 = arith.mulf %57, %60 : vector<8x17xf32>
    %63 = arith.mulf %59, %61 : vector<8x17xf32>
    %64 = arith.subf %62, %63 : vector<8x17xf32>
    %65 = arith.mulf %57, %61 : vector<8x17xf32>
    %66 = arith.mulf %59, %60 : vector<8x17xf32>
    %67 = arith.addf %65, %66 : vector<8x17xf32>
    %c0_39 = arith.constant 0 : index
    %c0_40 = arith.constant 0 : index
    %68 = vector.load %arg13[%c0_39, %c0_40] : memref<17x32xf32, #tpu.memory_space<vmem>>, vector<17x32xf32>
    %cst_41 = arith.constant dense<0.000000e+00> : vector<8x32xf32>
    %69 = tpu.matmul %64, %68, %cst_41 {dimension_numbers = #tpu.dot_dimension_numbers<[1], [0], [0], [1], [0, 0, 1, 1], [], []>} : vector<8x17xf32>, vector<17x32xf32>, vector<8x32xf32> -> vector<8x32xf32>
    %c0_42 = arith.constant 0 : index
    %c0_43 = arith.constant 0 : index
    %70 = vector.load %arg14[%c0_42, %c0_43] : memref<17x32xf32, #tpu.memory_space<vmem>>, vector<17x32xf32>
    %cst_44 = arith.constant dense<0.000000e+00> : vector<8x32xf32>
    %71 = tpu.matmul %67, %70, %cst_44 {dimension_numbers = #tpu.dot_dimension_numbers<[1], [0], [0], [1], [0, 0, 1, 1], [], []>} : vector<8x17xf32>, vector<17x32xf32>, vector<8x32xf32> -> vector<8x32xf32>
    %72 = arith.addf %69, %71 : vector<8x32xf32>
    %73 = arith.addf %72, %55 : vector<8x32xf32>
    %c0_45 = arith.constant 0 : index
    %c0_46 = arith.constant 0 : index
    %74 = vector.load %arg15[%c0_45, %c0_46] : memref<1x32xf32, #tpu.memory_space<vmem>>, vector<1x32xf32>
    %c0_47 = arith.constant 0 : index
    %c0_48 = arith.constant 0 : index
    %75 = vector.load %arg16[%c0_47, %c0_48] : memref<1x32xf32, #tpu.memory_space<vmem>>, vector<1x32xf32>
    %cst_49 = arith.constant dense<0.000000e+00> : vector<8xf32>
    %76 = vector.multi_reduction <add>, %73, %cst_49 [1] : vector<8x32xf32> to vector<8xf32>
    %77 = vector.shape_cast %76 : vector<8xf32> to vector<8x1xf32>
    %cst_50 = arith.constant 3.200000e+01 : f32
    %78 = vector.broadcast %cst_50 : f32 to vector<8x1xf32>
    %79 = arith.divf %77, %78 : vector<8x1xf32>
    %80 = vector.broadcast %79 : vector<8x1xf32> to vector<8x32xf32>
    %81 = arith.subf %73, %80 : vector<8x32xf32>
    %82 = arith.mulf %81, %81 : vector<8x32xf32>
    %cst_51 = arith.constant dense<0.000000e+00> : vector<8xf32>
    %83 = vector.multi_reduction <add>, %82, %cst_51 [1] : vector<8x32xf32> to vector<8xf32>
    %84 = vector.shape_cast %83 : vector<8xf32> to vector<8x1xf32>
    %cst_52 = arith.constant 3.200000e+01 : f32
    %85 = vector.broadcast %cst_52 : f32 to vector<8x1xf32>
    %86 = arith.divf %84, %85 : vector<8x1xf32>
    %87 = vector.broadcast %79 : vector<8x1xf32> to vector<8x32xf32>
    %88 = arith.subf %73, %87 : vector<8x32xf32>
    %cst_53 = arith.constant 9.99999996E-13 : f32
    %89 = vector.broadcast %cst_53 : f32 to vector<8x1xf32>
    %90 = arith.addf %86, %89 : vector<8x1xf32>
    %91 = math.rsqrt %90 : vector<8x1xf32>
    %92 = vector.broadcast %91 : vector<8x1xf32> to vector<8x32xf32>
    %93 = arith.mulf %88, %92 : vector<8x32xf32>
    %94 = vector.broadcast %74 : vector<1x32xf32> to vector<8x32xf32>
    %95 = arith.mulf %94, %93 : vector<8x32xf32>
    %96 = vector.broadcast %75 : vector<1x32xf32> to vector<8x32xf32>
    %97 = arith.addf %95, %96 : vector<8x32xf32>
    %98 = arith.addf %97, %1 : vector<8x32xf32>
    %c0_54 = arith.constant 0 : index
    %c0_55 = arith.constant 0 : index
    %99 = vector.load %arg17[%c0_54, %c0_55] : memref<1x32xf32, #tpu.memory_space<vmem>>, vector<1x32xf32>
    %c0_56 = arith.constant 0 : index
    %c0_57 = arith.constant 0 : index
    %100 = vector.load %arg18[%c0_56, %c0_57] : memref<1x32xf32, #tpu.memory_space<vmem>>, vector<1x32xf32>
    %cst_58 = arith.constant dense<0.000000e+00> : vector<8xf32>
    %101 = vector.multi_reduction <add>, %98, %cst_58 [1] : vector<8x32xf32> to vector<8xf32>
    %102 = vector.shape_cast %101 : vector<8xf32> to vector<8x1xf32>
    %cst_59 = arith.constant 3.200000e+01 : f32
    %103 = vector.broadcast %cst_59 : f32 to vector<8x1xf32>
    %104 = arith.divf %102, %103 : vector<8x1xf32>
    %105 = vector.broadcast %104 : vector<8x1xf32> to vector<8x32xf32>
    %106 = arith.subf %98, %105 : vector<8x32xf32>
    %107 = arith.mulf %106, %106 : vector<8x32xf32>
    %cst_60 = arith.constant dense<0.000000e+00> : vector<8xf32>
    %108 = vector.multi_reduction <add>, %107, %cst_60 [1] : vector<8x32xf32> to vector<8xf32>
    %109 = vector.shape_cast %108 : vector<8xf32> to vector<8x1xf32>
    %cst_61 = arith.constant 3.200000e+01 : f32
    %110 = vector.broadcast %cst_61 : f32 to vector<8x1xf32>
    %111 = arith.divf %109, %110 : vector<8x1xf32>
    %112 = vector.broadcast %104 : vector<8x1xf32> to vector<8x32xf32>
    %113 = arith.subf %98, %112 : vector<8x32xf32>
    %cst_62 = arith.constant 9.99999996E-13 : f32
    %114 = vector.broadcast %cst_62 : f32 to vector<8x1xf32>
    %115 = arith.addf %111, %114 : vector<8x1xf32>
    %116 = math.rsqrt %115 : vector<8x1xf32>
    %117 = vector.broadcast %116 : vector<8x1xf32> to vector<8x32xf32>
    %118 = arith.mulf %113, %117 : vector<8x32xf32>
    %119 = vector.broadcast %99 : vector<1x32xf32> to vector<8x32xf32>
    %120 = arith.mulf %119, %118 : vector<8x32xf32>
    %121 = vector.broadcast %100 : vector<1x32xf32> to vector<8x32xf32>
    %122 = arith.addf %120, %121 : vector<8x32xf32>
    %c0_63 = arith.constant 0 : index
    %c0_64 = arith.constant 0 : index
    %c0_65 = arith.constant 0 : index
    %123 = vector.load %arg19[%c0_63, %c0_64, %c0_65] : memref<1x8x32xf32, #tpu.memory_space<vmem>>, vector<1x8x32xf32>
    %124 = vector.shape_cast %123 : vector<1x8x32xf32> to vector<8x32xf32>
    %125 = vector.shape_cast %122 : vector<8x32xf32> to vector<1x8x32xf32>
    tpu.vector_store %arg19[%c0_63, %c0_64, %c0_65], %125 {strides = array<i32>} : memref<1x8x32xf32, #tpu.memory_space<vmem>>, vector<1x8x32xf32>,
    return
  }
  func.func @transform_0(%arg0: i32) -> (i32, i32, i32) {
    %c0_i32 = arith.constant 0 : i32
    %c0_i32_0 = arith.constant 0 : i32
    %c0_i32_1 = arith.constant 0 : i32
    return %arg0, %c0_i32, %c0_i32_0 : i32, i32, i32
  }
  func.func @transform_1(%arg0: i32) -> (i32, i32, i32) {
    %c0_i32 = arith.constant 0 : i32
    %c0_i32_0 = arith.constant 0 : i32
    %c0_i32_1 = arith.constant 0 : i32
    return %arg0, %c0_i32, %c0_i32_0 : i32, i32, i32
  }
  func.func @transform_2(%arg0: i32) -> (i32, i32) {
    %c0_i32 = arith.constant 0 : i32
    %c0_i32_0 = arith.constant 0 : i32
    %c0_i32_1 = arith.constant 0 : i32
    return %c0_i32, %c0_i32_0 : i32, i32
  }
  func.func @transform_3(%arg0: i32) -> (i32, i32) {
    %c0_i32 = arith.constant 0 : i32
    %c0_i32_0 = arith.constant 0 : i32
    %c0_i32_1 = arith.constant 0 : i32
    return %c0_i32, %c0_i32_0 : i32, i32
  }
  func.func @transform_4(%arg0: i32) -> (i32, i32) {
    %c0_i32 = arith.constant 0 : i32
    %c0_i32_0 = arith.constant 0 : i32
    %c0_i32_1 = arith.constant 0 : i32
    return %c0_i32, %c0_i32_0 : i32, i32
  }
  func.func @transform_5(%arg0: i32) -> (i32, i32) {
    %c0_i32 = arith.constant 0 : i32
    %c0_i32_0 = arith.constant 0 : i32
    %c0_i32_1 = arith.constant 0 : i32
    return %c0_i32, %c0_i32_0 : i32, i32
  }
  func.func @transform_6(%arg0: i32) -> (i32, i32) {
    %c0_i32 = arith.constant 0 : i32
    %c0_i32_0 = arith.constant 0 : i32
    %c0_i32_1 = arith.constant 0 : i32
    return %c0_i32, %c0_i32_0 : i32, i32
  }
  func.func @transform_7(%arg0: i32) -> (i32, i32) {
    %c0_i32 = arith.constant 0 : i32
    %c0_i32_0 = arith.constant 0 : i32
    %c0_i32_1 = arith.constant 0 : i32
    return %c0_i32, %c0_i32_0 : i32, i32
  }
  func.func @transform_8(%arg0: i32) -> (i32, i32) {
    %c0_i32 = arith.constant 0 : i32
    %c0_i32_0 = arith.constant 0 : i32
    %c0_i32_1 = arith.constant 0 : i32
    return %c0_i32, %c0_i32_0 : i32, i32
  }
  func.func @transform_9(%arg0: i32) -> (i32, i32) {
    %c0_i32 = arith.constant 0 : i32
    %c0_i32_0 = arith.constant 0 : i32
    %c0_i32_1 = arith.constant 0 : i32
    return %c0_i32, %c0_i32_0 : i32, i32
  }
  func.func @transform_10(%arg0: i32) -> (i32, i32) {
    %c0_i32 = arith.constant 0 : i32
    %c0_i32_0 = arith.constant 0 : i32
    %c0_i32_1 = arith.constant 0 : i32
    return %c0_i32, %c0_i32_0 : i32, i32
  }
  func.func @transform_11(%arg0: i32) -> (i32, i32) {
    %c0_i32 = arith.constant 0 : i32
    %c0_i32_0 = arith.constant 0 : i32
    %c0_i32_1 = arith.constant 0 : i32
    return %c0_i32, %c0_i32_0 : i32, i32
  }
  func.func @transform_12(%arg0: i32) -> (i32, i32) {
    %c0_i32 = arith.constant 0 : i32
    %c0_i32_0 = arith.constant 0 : i32
    %c0_i32_1 = arith.constant 0 : i32
    return %c0_i32, %c0_i32_0 : i32, i32
  }
  func.func @transform_13(%arg0: i32) -> (i32, i32) {
    %c0_i32 = arith.constant 0 : i32
    %c0_i32_0 = arith.constant 0 : i32
    %c0_i32_1 = arith.constant 0 : i32
    return %c0_i32, %c0_i32_0 : i32, i32
  }
  func.func @transform_14(%arg0: i32) -> (i32, i32) {
    %c0_i32 = arith.constant 0 : i32
    %c0_i32_0 = arith.constant 0 : i32
    %c0_i32_1 = arith.constant 0 : i32
    return %c0_i32, %c0_i32_0 : i32, i32
  }
  func.func @transform_15(%arg0: i32) -> (i32, i32) {
    %c0_i32 = arith.constant 0 : i32
    %c0_i32_0 = arith.constant 0 : i32
    %c0_i32_1 = arith.constant 0 : i32
    return %c0_i32, %c0_i32_0 : i32, i32
  }
  func.func @transform_16(%arg0: i32) -> (i32, i32) {
    %c0_i32 = arith.constant 0 : i32
    %c0_i32_0 = arith.constant 0 : i32
    %c0_i32_1 = arith.constant 0 : i32
    return %c0_i32, %c0_i32_0 : i32, i32
  }
  func.func @transform_17(%arg0: i32) -> (i32, i32) {
    %c0_i32 = arith.constant 0 : i32
    %c0_i32_0 = arith.constant 0 : i32
    %c0_i32_1 = arith.constant 0 : i32
    return %c0_i32, %c0_i32_0 : i32, i32
  }
  func.func @transform_18(%arg0: i32) -> (i32, i32, i32) {
    %c0_i32 = arith.constant 0 : i32
    %c0_i32_0 = arith.constant 0 : i32
    %c0_i32_1 = arith.constant 0 : i32
    return %arg0, %c0_i32, %c0_i32_0 : i32, i32, i32
  }
}

</mosaic_0001>

<bundles_post_ra>
// kernel: tpu_custom_call.1
= control target key start
LH: loop header
LB: loop body
LE: loop exit
PB: predicated region body
PF: predicated region fallthrough
CT: control target
= control target key end

     0   :  { %s3001_s0 = inlined_call_operand.hbm [shape: f32[2,8,32], index: 0, kind: input, shape index: {}]   ;;  %s3002_s1 = inlined_call_operand.hbm [shape: f32[2,8,8], index: 1, kind: input, shape index: {}]   ;;  %s3003_s2 = inlined_call_operand.vmem [shape: f32[32,32], index: 2, kind: input, shape index: {}]   ;;  %s3004_s3 = inlined_call_operand.hbm [shape: f32[1,32], index: 3, kind: input, shape index: {}]   ;;  %s3005_s4 = inlined_call_operand.vmem [shape: f32[32,32], index: 4, kind: input, shape index: {}]   ;;  %s3006_s5 = inlined_call_operand.hbm [shape: f32[1,32], index: 5, kind: input, shape index: {}]   ;;  %s3007_s6 = inlined_call_operand.vmem [shape: f32[32,32], index: 6, kind: input, shape index: {}]   ;;  %s3008_s7 = inlined_call_operand.hbm [shape: f32[1,32], index: 7, kind: input, shape index: {}]   ;;  %s3009_s8 = inlined_call_operand.hbm [shape: f32[8,17], index: 8, kind: input, shape index: {}]   ;;  %s3010_s9 = inlined_call_operand.vmem [shape: f32[8,17], index: 9, kind: input, shape index: {}]   ;;  %s3011_s10 = inlined_call_operand.vmem [shape: f32[32,17], index: 10, kind: input, shape index: {}]   ;;  %s3012_s11 = inlined_call_operand.vmem [shape: f32[32,17], index: 11, kind: input, shape index: {}]   ;;  %s3013_s12 = inlined_call_operand.hbm [shape: f32[17,32], index: 12, kind: input, shape index: {}]   ;;  %s3014_s13 = inlined_call_operand.hbm [shape: f32[17,32], index: 13, kind: input, shape index: {}]   ;;  %s3015_s14 = inlined_call_operand.vmem [shape: f32[1,32], index: 14, kind: input, shape index: {}]   ;;  %s3016_s15 = inlined_call_operand.vmem [shape: f32[1,32], index: 15, kind: input, shape index: {}]   ;;  %s3017_s16 = inlined_call_operand.vmem [shape: f32[1,32], index: 16, kind: input, shape index: {}]   ;;  %s3018_s17 = inlined_call_operand.vmem [shape: f32[1,32], index: 17, kind: input, shape index: {}]   ;;  %s3019_s18 = inlined_call_operand.hbm [shape: f32[2,8,32], index: 18, kind: output, shape index: {}]  }
   0x1   :  { %3035 = sst [smem:[#allocation30_spill]] %s3001_s0 }
   0x2   :  { %3036 = sst [smem:[#allocation31_spill]] %s3002_s1 }
   0x3   :  { %3037 = sst [smem:[#allocation32_spill]] %s3003_s2 }
   0x4   :  { %3038 = sst [smem:[#allocation33_spill]] %s3004_s3 }
   0x5   :  { %3039 = sst [smem:[#allocation34_spill]] %s3006_s5 }
   0x6   :  { %3040 = sst [smem:[#allocation35_spill]] %s3008_s7 }
   0x7   :  { %3041 = sst [smem:[#allocation36_spill]] %s3009_s8 }
   0x8   :  { %3042 = sst [smem:[#allocation37_spill]] %s3013_s12 }
   0x9   :  { %3043 = sst [smem:[#allocation38_spill]] %s3014_s13 }
   0xa   :  { %3044 = sst [smem:[#allocation39_spill]] %s3017_s16 }
   0xb   :  { %3045 = sst [smem:[#allocation40_spill]] %s3018_s17 }
   0xc   :  { %3046 = sst [smem:[#allocation41_spill]] %s3019_s18 }
   0xd   :  { %23 = vsyncpa [#allocation3], 0 }
   0xe   :  { %25 = vsyncpa [#allocation3 + $0x1], 0 }
   0xf   :  { %26 = vsyncpa [#allocation6], 0 }
  0x10   :  { %28 = vsyncpa [#allocation6 + $0x1], 0 }
  0x11   :  { %29 = vsyncpa [#allocation9], 0 }
  0x12   :  { %30 = vsyncpa [#allocation12], 0 }
  0x13   :  { %31 = vsyncpa [#allocation15], 0 }
  0x14   :  { %32 = vsyncpa [#allocation4], 0 }
  0x15   :  { %34 = vsyncpa [#allocation4 + $0x1], 0  ;;  %s2559_s27 = smov 0   ;;  %s2561_s28 = smov 0  }
  0x16   :  { %s2563_s29 = smov 0   ;;  %s2565_s30 = smov 0  }
  0x17 LB: > { %3047 = sst [smem:[#allocation24_spill]] %s2435_s27  ;;  %s2449_s0 = smov [#allocation7]   ;;  %s2447_s30 = sphi %s2565_s30, %s3091_s30   ;;  %s2443_s29 = sphi %s2563_s29, %s3093_s29   ;;  %s2439_s28 = sphi %s2561_s28, %s3095_s28   ;;  %s2435_s27 = sphi %s2559_s27, %s3094_s27  }
  0x18   : > { %3048 = sst [smem:[#allocation25_spill]] %s2443_s29  ;;  %s475_s19 = sshll.u32 %s2449_s0, 4  ;;  %s476_s19 = int_to_ptr.vmem [resolvable:$true] %s475_s19 }
  0x19   : > { %s2580_s1 = sadd.s32 4294967295, %s2447_s30   ;;  %p1839_p0 = scmp.ge.s32.totalorder %s2447_s30, 1 }
  0x1a   : > { %p3024_p1 = scmp.eq.s32.totalorder %s2580_s1, 0  ;;  %p459_p2 = scmp.lt.s32.totalorder %s2447_s30, 3 }
  0x1b   : > { %s2450_s21 = smov [#allocation8]   ;;  %s2451_s2 = smov [#allocation11]  }
  0x1c   : > { %p2585_p3 = pnand %p1839_p0, %p459_p2  ;;  %s489_s22 = sshll.u32 %s2450_s21, 4  ;;  %s2592_s22 = int_to_ptr.vmem [resolvable:$true] %s489_s22 }
  0x1d   : > { %s514_s23 = sshll.u32 %s2451_s2, 4  ;;  %s2452_s25 = smov [#allocation10]   ;;  %s2600_s23 = int_to_ptr.vmem [resolvable:$true] %s514_s23 }
  0x1e   : > { %s3049_s20 = scalar_select %p2585_p3, 1, 0 }
  0x1f   : > { %p2051_p5 = pneg %p2585_p3  ;;  %s2602_s26 = sshll.u32 %s2452_s25, 4  ;;  %s504_s26 = int_to_ptr.vmem [resolvable:$true] %s2602_s26 }
  0x20   : > { %s2162_s21 = scalar_lea.vmem %s476_s19, 16  ;;  %s2169_s2 = scalar_lea.vmem %s476_s19, 32 }
  0x21   : > { %p2596_p6 = pnand %p2051_p5, %p3024_p1  ;;  %p2163_p8 = scmp.ne.s32.totalorder %s476_s19, %s2162_s21 }
  0x22   : > { %p2170_p11 = scmp.lt.s32.totalorder %s476_s19, %s476_s19  ;;  %p2171_p12 = scmp.lt.s32.totalorder %s2169_s2, %s2162_s21 }
  0x23   : > { %p2606_p7 = pneg %p2596_p6 }
  0x24   : > { %p2172_p13 = por %p2171_p12, %p2170_p11 }
  0x25   : > { %p2165_p9 = pnand %p2163_p8, %p2606_p7 }
  0x27   : > { %p2166_p10 = pneg %p2165_p9 }
  0x29   : > { %p2173_p0 = pnand %p2172_p13, %p2166_p10 }
  0x2b   : > { %2176 = shalt.err (!%p2173_p0)
}
  0x2c   : > { %s3052_s3 = sld [smem:[#allocation33_spill]]  ;;  %s2188_s17 = scalar_lea.vmem %s2592_s22, 16 }
  0x2d   : > { %p2189_p2 = scmp.ne.s32.totalorder %s2592_s22, %s2188_s17  ;;  %s2195_s21 = scalar_lea.vmem %s2592_s22, 32 }
  0x2e   : > { %p2196_p9 = scmp.lt.s32.totalorder %s2592_s22, %s2592_s22  ;;  %p2197_p10 = scmp.lt.s32.totalorder %s2195_s21, %s2188_s17 }
  0x2f   : > { %p2191_p5 = pnand %p2189_p2, %p2606_p7 }
  0x30   : > { %p2198_p11 = por %p2197_p10, %p2196_p9 }
  0x31   : > { %p2192_p8 = pneg %p2191_p5 }
  0x32   : > { %2054 = dma.hbm_to_vmem [thread:$0]  (!%p2596_p6), %s3052_s3, 16, %s476_s19, [#allocation6]  }
  0x33   : > { %p2199_p12 = pnand %p2198_p11, %p2192_p8 }
  0x35   : > { %2202 = shalt.err (!%p2199_p12)
}
  0x36   : > { %s3053_s5 = sld [smem:[#allocation34_spill]]  ;;  %s2214_s19 = scalar_lea.vmem %s2600_s23, 128 }
  0x37   : > { %p2215_p13 = scmp.ne.s32.totalorder %s2600_s23, %s2214_s19  ;;  %p2222_p5 = scmp.lt.s32.totalorder %s2600_s23, %s2600_s23 }
  0x38   : > { %p2223_p8 = scmp.lt.s32.totalorder %s2214_s19, %s2214_s19 }
  0x39   : > { %p2217_p0 = pnand %p2215_p13, %p2606_p7 }
  0x3a   : > { %p2224_p9 = por %p2223_p8, %p2222_p5 }
  0x3b   : > { %p2218_p2 = pneg %p2217_p0 }
  0x3c   : > { %2057 = dma.hbm_to_vmem [thread:$0]  (!%p2596_p6), %s3053_s5, 16, %s2592_s22, [#allocation9]  }
  0x3d   : > { %p2225_p10 = pnand %p2224_p9, %p2218_p2 }
  0x3f   : > { %2228 = shalt.err (!%p2225_p10)
}
  0x40   : > { %s3054_s8 = sld [smem:[#allocation36_spill]]  ;;  %s2453_s22 = smov [#allocation13]  }
  0x41   : > { %s533_s21 = sshll.u32 %s2453_s22, 4  ;;  %s2240_s18 = scalar_lea.vmem %s504_s26, 16  ;;  %s534_s21 = int_to_ptr.vmem [resolvable:$true] %s533_s21 }
  0x42   : > { %p2241_p11 = scmp.ne.s32.totalorder %s504_s26, %s2240_s18  ;;  %s2247_s2 = scalar_lea.vmem %s504_s26, 32 }
  0x43   : > { %p2248_p0 = scmp.lt.s32.totalorder %s504_s26, %s504_s26  ;;  %p2249_p2 = scmp.lt.s32.totalorder %s2247_s2, %s2240_s18 }
  0x44   : > { %p2243_p12 = pnand %p2241_p11, %p2606_p7 }
  0x45   : > { %p2250_p5 = por %p2249_p2, %p2248_p0 }
  0x46   : > { %2063 = dma.hbm_to_vmem [thread:$0]  (!%p2596_p6), %s3054_s8, 128, %s2600_s23, [#allocation12]  }
  0x47   : > { %p2244_p13 = pneg %p2243_p12 }
  0x49   : > { %p2251_p8 = pnand %p2250_p5, %p2244_p13 }
  0x4b   : > { %2254 = shalt.err (!%p2251_p8)
}
  0x4c   : > { %s3055_s7 = sld [smem:[#allocation35_spill]]  ;;  %s2266_s23 = scalar_lea.vmem %s534_s21, 384 }
  0x4d   : > { %p2267_p9 = scmp.ne.s32.totalorder %s534_s21, %s2266_s23  ;;  %p2274_p12 = scmp.lt.s32.totalorder %s534_s21, %s534_s21 }
  0x4e   : > { %p2275_p4 = scmp.lt.s32.totalorder %s2266_s23, %s2266_s23 }
  0x4f   : > { %p2269_p10 = pnand %p2267_p9, %p2606_p7 }
  0x50   : > { %p2276_p1 = por %p2275_p4, %p2274_p12 }
  0x51   : > { %p2270_p11 = pneg %p2269_p10 }
  0x52   : > { %2060 = dma.hbm_to_vmem [thread:$0]  (!%p2596_p6), %s3055_s7, 16, %s504_s26, [#allocation9]  }
  0x53   : > { %p2277_p3 = pnand %p2276_p1, %p2270_p11 }
  0x55   : > { %2280 = shalt.err (!%p2277_p3)
}
  0x56   : > { %s2454_s25 = smov 128   ;;  %s2455_s22 = smov 8  }
  0x57   : > { %s3056_s12 = sld [smem:[#allocation37_spill]]  ;;  %s2456_s26 = smov [#allocation14]  }
  0x58   : > { %s546_s19 = sshll.u32 %s2456_s26, 4  ;;  %s547_s19 = int_to_ptr.vmem [resolvable:$true] %s546_s19 }
  0x59   : > { %s2292_s17 = scalar_lea.vmem %s547_s19, 384  ;;  %p2300_p4 = scmp.lt.s32.totalorder %s547_s19, %s547_s19 }
  0x5a   : > { %p2293_p13 = scmp.ne.s32.totalorder %s547_s19, %s2292_s17  ;;  %p2301_p1 = scmp.lt.s32.totalorder %s2292_s17, %s2292_s17 }
  0x5c   : > { %p2295_p0 = pnand %p2293_p13, %p2606_p7  ;;  %p2302_p3 = por %p2301_p1, %p2300_p4 }
  0x5d   : > { %2066 = dma.hbm_to_vmem [thread:$0]  (!%p2596_p6), %s3056_s12, 384, %s534_s21, [#allocation12], %s2454_s25, %s2454_s25, %s2455_s22  }
  0x5e   : > { %p2296_p2 = pneg %p2295_p0 }
  0x60   : > { %p2303_p5 = pnand %p2302_p3, %p2296_p2 }
  0x62   : > { %2306 = shalt.err (!%p2303_p5)
}
  0x63   : > { %s3057_s13 = sld [smem:[#allocation38_spill]]  ;;  %s1838_s0 = sadd.s32 4294967294, %s2447_s30  }
  0x64   : > { %s2666_s24 = sadd.s32 1, %s2447_s30   ;;  %s47_s21 = sadd.s32 1, %s2443_s29 }
  0x65   : > { %3058 = sst [smem:[#allocation26_spill]] %s2666_s24  ;;  %s44_s3 = ssub.s32 %s2447_s30, %s2666_s24 }
  0x66   : > { %p45_p7 = scmp.eq.s32.totalorder %s44_s3, 0  ;;  %p54_p8 = scmp.ne.s32.totalorder %s2443_s29, %s2439_s28 }
  0x67   : > { %p55_p9 = scmp.eq.s32.totalorder %s2447_s30, 0  ;;  %p60_p10 = scmp.ne.s32.totalorder %s2439_s28, %s2435_s27 }
  0x68   : > { %s2677_s18 = scalar_select %p45_p7, %s2443_s29, %s47_s21  }
  0x69   : > { %2069 = dma.hbm_to_vmem [thread:$0]  (!%p2596_p6), %s3057_s13, 384, %s547_s19, [#allocation15], %s2454_s25, %s2454_s25, %s2455_s22  }
  0x6a   : > { %3059 = sst [smem:[#allocation27_spill]] %s2677_s18  ;;  %p2679_p11 = por %p55_p9, %p54_p8 }
  0x6b   : > { %p3061_p12 = scmp.eq.s32.totalorder %s2580_s1, 0  ;;  %p446_p13 = scmp.eq.s32.totalorder %s2580_s1, 1 }
  0x6c   : > { %p452_p0 = scmp.eq.s32.totalorder %s1838_s0, 1  ;;  %p2087_p2 = scmp.lt.s32.totalorder %s2447_s30, 2 }
  0x6d   : > { %p2685_p6 = por %p3061_p12, %p60_p10  ;;  %s572_s22 = sand.u32 1, %s2443_s29  }
  0x6e   : > { %p2692_p4 = por %p446_p13, %p54_p8  ;;  %p2696_p1 = por %p452_p0, %p60_p10 }
  0x6f   : > { %s3062_s25 = scalar_select %p2685_p6, 1, 0 }
  0x70   : > { %s3063_s26 = scalar_select %p2692_p4, 1, 0 }
  0x71   : > { %s3065_s19 = scalar_select %p2696_p1, 1, 0 }
  0x72   : > { %3064 = sst [smem:[#allocation28_spill]] %s3063_s26  ;;  %s2700_s17 = sshll.u32 %s572_s22, 3 }
  0x73   : > { %3066 = sst [smem:[#allocation29_spill]] %s3065_s19  ;;  %s1848_s23 = sshll.u32 %s2447_s30, 7 }
  0x74   : > { %s3067_s5 = sld [smem:[#allocation30_spill]]  ;;  %s576_s0 = scalar_lea.vmem [#allocation2], %s2700_s17 }
  0x75   : > { %s583_s8 = sshll.u32 %s576_s0, 4  ;;  %p2713_p3 = pnand %p2087_p2, %p2679_p11  ;;  %s2709_s8 = int_to_ptr.vmem [resolvable:$true] %s583_s8 }
  0x76   : > { %s3069_s29 = sld [smem:[#allocation31_spill]]  ;;  %s590_s21 = sand.u32 1, %s2447_s30  }
  0x77   : > { %s573_s19 = scalar_lea.sflag [#allocation3], %s572_s22  ;;  %p2309_p7 = pneg %p2713_p3 }
  0x7a   : > { %s2706_s7 = scalar_lea.hbm %s3067_s5, %s1848_s23  ;;  %s2312_s16 = scalar_lea.hbm %s3067_s5, 256 }
  0x7b   : > { %s2307_s27 = scalar_lea.hbm %s2706_s7, 128  ;;  %p2313_p10 = scmp.lt.s32.totalorder %s2706_s7, %s3067_s5 }
  0x7c   : > { %s3070_s24 = smov %s3069_s29  ;;  %s2720_s3 = scalar_lea.hbm %s3069_s29, %s1848_s23 }
  0x7d   : > { %p2308_p5 = scmp.ne.s32.totalorder %s2706_s7, %s2307_s27  ;;  %p2314_p11 = scmp.lt.s32.totalorder %s2312_s16, %s2307_s27 }
  0x7f   : > { %p2310_p8 = pnand %p2309_p7, %p2308_p5  ;;  %p2315_p12 = por %p2314_p11, %p2313_p10 }
  0x81   : > { %p2311_p9 = pneg %p2310_p8 }
  0x83   : > { %p2316_p13 = pnand %p2315_p12, %p2311_p9 }
  0x85   : > { %2319 = shalt.err (!%p2316_p13)
}
  0x86   : > { %s2320_s29 = scalar_lea.vmem %s2709_s8, 128  ;;  %s2457_s18 = smov [#allocation2]  }
  0x87   : > { %p2321_p0 = scmp.ne.s32.totalorder %s2709_s8, %s2320_s29  ;;  %s2325_s22 = sshll.u32 %s2457_s18, 4  ;;  %s2326_s22 = int_to_ptr.vmem [resolvable:$false] %s2325_s22 }
  0x88   : > { %s2327_s23 = scalar_lea.vmem %s2326_s22, 256  ;;  %p2328_p8 = scmp.lt.s32.totalorder %s2709_s8, %s2326_s22 }
  0x89   : > { %p2323_p2 = pnand %p2321_p0, %p2309_p7  ;;  %p2329_p1 = scmp.lt.s32.totalorder %s2327_s23, %s2320_s29 }
  0x8b   : > { %p2324_p5 = pneg %p2323_p2  ;;  %p2330_p4 = por %p2329_p1, %p2328_p8 }
  0x8d   : > { %p2331_p10 = pnand %p2330_p4, %p2324_p5 }
  0x8f   : > { %2334 = shalt.err (!%p2331_p10)
}
  0x90   : > { %2073 = dma.hbm_to_vmem [thread:$0]  (!%p2713_p3), %s2706_s7, 128, %s2709_s8, %s573_s19  }
  0x91   : > { %s594_s16 = scalar_lea.vmem [#allocation5], %s2700_s17  ;;  %s591_s26 = scalar_lea.sflag [#allocation6], %s590_s21 }
  0x92   : > { %s601_s27 = sshll.u32 %s594_s16, 4  ;;  %s2335_s2 = scalar_lea.hbm %s2720_s3, 128  ;;  %s602_s27 = int_to_ptr.vmem [resolvable:$true] %s601_s27 }
  0x93   : > { %p2336_p1 = scmp.ne.s32.totalorder %s2720_s3, %s2335_s2  ;;  %s2340_s29 = scalar_lea.hbm %s3070_s24, 256 }
  0x94   : > { %p2341_p11 = scmp.lt.s32.totalorder %s2720_s3, %s3070_s24  ;;  %p2342_p12 = scmp.lt.s32.totalorder %s2340_s29, %s2335_s2 }
  0x95   : > { %p2338_p4 = pnand %p2336_p1, %p2309_p7 }
  0x96   : > { %p2343_p13 = por %p2342_p12, %p2341_p11 }
  0x97   : > { %p2339_p9 = pneg %p2338_p4 }
  0x99   : > { %p2344_p0 = pnand %p2343_p13, %p2339_p9 }
  0x9b   : > { %2347 = shalt.err (!%p2344_p0)
}
  0x9c   : > { %s2348_s7 = scalar_lea.vmem %s602_s27, 128  ;;  %s2458_s8 = smov [#allocation5]  }
  0x9d   : > { %p2349_p2 = scmp.ne.s32.totalorder %s602_s27, %s2348_s7  ;;  %s2353_s19 = sshll.u32 %s2458_s8, 4  ;;  %s2354_s19 = int_to_ptr.vmem [resolvable:$false] %s2353_s19 }
  0x9e   : > { %s2355_s17 = scalar_lea.vmem %s2354_s19, 256  ;;  %p2356_p10 = scmp.lt.s32.totalorder %s602_s27, %s2354_s19 }
  0x9f   : > { %p2351_p5 = pnand %p2349_p2, %p2309_p7  ;;  %p2357_p1 = scmp.lt.s32.totalorder %s2355_s17, %s2348_s7 }
  0xa1   : > { %p2352_p8 = pneg %p2351_p5  ;;  %p2358_p4 = por %p2357_p1, %p2356_p10 }
  0xa3   : > { %p2359_p6 = pnand %p2358_p4, %p2352_p8 }
  0xa5   : > { %2362 = shalt.err (!%p2359_p6)
}
  0xa6   : > { %2076 = dma.hbm_to_vmem [thread:$0]  (!%p2713_p3), %s2720_s3, 128, %s602_s27, %s591_s26  }
  0xa7   : > { %p3071_p9 = scmp.ne.s32.totalorder %s3049_s20, 0 }
  0xa8   : > { %s2771_s21 = sand.u32 (!%p3071_p9), 1, %s2439_s28   ;;  %p3072_p7 = scmp.ne.s32.totalorder (!%p3071_p9), %s3062_s25, 0 }
  0xa9   : > { %610 = sbr.rel (%p3071_p9) target bundleno = 2358 (0x936), region = 92  ;;  %s2774_s23 = sshll.u32 (!%p3071_p9), %s2771_s21, 3 }
  0xaa   : > { %s613_s16 = scalar_lea.sflag (!%p3071_p9), [#allocation3], %s2771_s21  ;;  %s616_s2 = scalar_lea.vmem (!%p3071_p9), [#allocation2], %s2774_s23 }
  0xae   : > { %2406 = dma.done.wait (%p3072_p7), %s613_s16, 128  }
  0xaf   : > { %2408 = vsyncadd (%p3072_p7), %s613_s16, 4294967168  ;;  %s621_s12 = sand.u32 1, %s2580_s1   ;;  %s625_s3 = scalar_lea.vmem [#allocation5], %s2774_s23 }
  0xb0   : > { %s622_s20 = scalar_lea.sflag [#allocation6], %s621_s12 }
  0xb1   : > { %2410 = dma.done.wait (%p3072_p7), %s622_s20, 128  }
  0xb2   : > { %2412 = vsyncadd (%p3072_p7), %s622_s20, 4294967168  ;;  %p3073_p6 = scmp.eq.s32.totalorder %s2580_s1, 0 }
  0xb4   : > { %2414 = dma.done.wait (%p3073_p6), [#allocation6], 16   ;;  %p3074_p3 = pmov %p3073_p6 }
  0xb6   : > { %2416 = vsyncadd (%p3074_p3), [#allocation6], 4294967280  ;;  %p3075_p11 = pmov %p3074_p3 }
  0xb7   : > { %p3076_p12 = pmov %p3074_p3 }
  0xb8   : > { %2418 = dma.done.wait (%p3075_p11), [#allocation9], 32  }
  0xb9   : > { %2420 = vsyncadd (%p3076_p12), [#allocation9], 4294967264  ;;  %p3077_p13 = pmov %p3074_p3 }
  0xba   : > { %p3078_p0 = pmov %p3074_p3 }
  0xbb   : > { %2422 = dma.done.wait (%p3077_p13), [#allocation12], 512  }
  0xbc   : > { %2424 = vsyncadd (%p3078_p0), [#allocation12], 4294966784  ;;  %p3079_p2 = pmov %p3078_p0 }
  0xbd   : > { %p3080_p5 = pmov %p3078_p0 }
  0xbe   : > { %2426 = dma.done.wait (%p3079_p2), [#allocation15], 384  }
  0xbf   : > { %2428 = vsyncadd (%p3080_p5), [#allocation15], 4294966912  ;;  %v2459_v0 = vmov 0.0   ;;  %vm2460_vm0 = vmmov 0   ;;  %v797_v1 = vld [vmem:[%s3005_s4 + $0x18] sm:$0xff]  ;;  %s3081_s13 = sld [smem:[#allocation32_spill]] }
  0xc0   : > { %1939 = vmatprep.subr.mxu1 %v2459_v0  ;;  %1928 = vmatprep.subr.mxu0 %v2459_v0  ;;  %v796_v3 = vld [vmem:[%s3005_s4 + $0x10] sm:$0xff]  ;;  %v795_v5 = vld [vmem:[%s3005_s4 + $0x8] sm:$0xff]  ;;  %v794_v7 = vld [vmem:[%s3005_s4] sm:$0xff]  ;;  %vm720_vm1 = vcmask 261120   ;;  %vm956_vm2 = vcmask 130048   ;;  %s2461_s19 = smov 112  }
  0xc1   : > { %1947 = vmatprep.mubr.msk.f32.mxu1 %vm2460_vm0, %v2459_v0  ;;  %1936 = vmatprep.mubr.msk.f32.mxu0 %vm2460_vm0, %v2459_v0  ;;  %v2840_v9 = vld [vmem:[%s616_s2] sm:$0xff]  ;;  %v878_v10 = vld [vmem:[%s3007_s6 + $0x18] sm:$0xff]  ;;  %v877_v11 = vld [vmem:[%s3007_s6 + $0x10] sm:$0xff]  ;;  %vm1035_vm3 = vcmask 64512   ;;  %vm1462_vm4 = vcmask 1040384   ;;  %vm1458_vm5 = vcmask 138240  }
  0xc2   : > { %1940 = vmatpush3.msra.mxu1 %v797_v1  ;;  %v876_v12 = vld [vmem:[%s3007_s6 + $0x8] sm:$0xff]  ;;  %v875_v13 = vld [vmem:[%s3007_s6] sm:$0xff]  ;;  %v708_v29 = vld [vmem:[%s625_s3] sm:$0xff]  ;;  %s2462_s3 = smov 16   ;;  %s3082_s2 = sld [smem:[#allocation28_spill]] }
  0xc3   : > { %1941 = vmatprep.subr.mxu1 %v2459_v0  ;;  %v1863_v14 = vld [vmem:[#allocation8] ss:$0 sm:$0xff]  ;;  %v1861_v15 = vld [vmem:[#allocation7] ss:$0 sm:$0xff]  ;;  %v1865_v22 = vld [vmem:[#allocation10] ss:$0 sm:$0xff] }
  0xc4   : > { %1942 = vmatpush3.msra.mxu1 %v796_v3  ;;  %v1296_v56 = vld [vmem:[%s3011_s10 + $0x18] sm:$0xff]  ;;  %v1295_v58 = vld [vmem:[%s3011_s10 + $0x10] sm:$0xff]  ;;  %v1294_v60 = vld [vmem:[%s3011_s10 + $0x8] sm:$0xff]  ;;  %s3083_s29 = sld [smem:[#allocation39_spill]]  ;;  %s1884_s8 = sshll.u32 %s2580_s1, 7 }
  0xc5   : > { %v712_v2 = vld [vmem:[%s3081_s13 + $0x18] sm:$0xff]  ;;  %v711_v4 = vld [vmem:[%s3081_s13 + $0x10] sm:$0xff]  ;;  %v710_v6 = vld [vmem:[%s3081_s13 + $0x8] sm:$0xff]  ;;  %1943 = vmatprep.subr.mxu1 %v2459_v0  ;;  %s3084_s7 = sld [smem:[#allocation40_spill]]  ;;  %s1675_s25 = scalar_lea.sflag [#allocation4], %s2771_s21 }
  0xc6   : > { %1929 = vmatpush3.msra.mxu0 %v712_v2  ;;  %v709_v8 = vld [vmem:[%s3081_s13] sm:$0xff]  ;;  %1944 = vmatpush3.msra.mxu1 %v795_v5  ;;  %v1373_v57 = vld [vmem:[%s3012_s11 + $0x18] sm:$0xff]  ;;  %v1372_v59 = vld [vmem:[%s3012_s11 + $0x10] sm:$0xff]  ;;  %s3085_s12 = sld [smem:[#allocation41_spill]]  ;;  %s2463_s26 = smov [#allocation16]  }
  0xc7   : > { %1930 = vmatprep.subr.mxu0 %v2459_v0  ;;  %1945 = vmatprep.subr.mxu1 %v2459_v0  ;;  %v1371_v61 = vld [vmem:[%s3012_s11 + $0x8] sm:$0xff]  ;;  %v1293_v1 = vld [vmem:[%s3011_s10] sm:$0xff]  ;;  %s2367_s0 = sshll.u32 %s2463_s26, 4  ;;  %s2368_s0 = int_to_ptr.vmem [resolvable:$false] %s2367_s0 }
  0xc8   : > { %1931 = vmatpush3.msra.mxu0 %v711_v4  ;;  %1946 = vmatpush3.msra.mxu1 %v794_v7  ;;  %v1370_v2 = vld [vmem:[%s3012_s11] sm:$0xff]  ;;  %v1457_v7 = vld [vmem:[#allocation14 + $0x10] sm:$0x1]  ;;  %p3086_p10 = scmp.ne.s32.totalorder %s3082_s2, 0  ;;  %s2369_s1 = scalar_lea.vmem %s2368_s0, 256 }
  0xc9   : > { %1932 = vmatprep.subr.mxu0 %v2459_v0  ;;  %1948 = vmatmul.mubr.msk.f32.vlgmr.msra.gmra.mxu1 %vm720_vm1, %v2840_v9 }
  0xca   : > { %1933 = vmatpush3.msra.mxu0 %v710_v6  ;;  %1961 = vmatprep.subr.mxu1 %v2459_v0 }
  0xcb   : > { %1934 = vmatprep.subr.mxu0 %v2459_v0  ;;  %1963 = vmatprep.mubr.msk.f32.mxu1 %vm2460_vm0, %v2459_v0 }
  0xcc   : > { %1935 = vmatpush3.msra.mxu0 %v709_v8  ;;  %v1454_v8 = vld [vmem:[#allocation13 + $0x10] sm:$0x1]  ;;  %s1686_s20 = scalar_lea.hbm %s3085_s12, %s1884_s8 }
  0xcd   : > { %1937 = vmatmul.mubr.msk.f32.vlgmr.msra.gmra.mxu0 %vm720_vm1, %v2840_v9  ;;  %1950 = vmatprep.subr.mxu0 %v2459_v0 }
  0xce   : > { %1958 = vmatprep.mubr.msk.f32.mxu0 %vm2460_vm0, %v2459_v0  ;;  %1951 = vmatpush3.msra.mxu0 %v878_v10  ;;  %v1456_v10 = vld [vmem:[#allocation14 + $0x8] sm:$0xff] }
  0xcf   : > { %1952 = vmatprep.subr.mxu0 %v2459_v0 }
  0xd0   : > { %1953 = vmatpush3.msra.mxu0 %v877_v11  ;;  %v1453_v11 = vld [vmem:[#allocation13 + $0x8] sm:$0xff] }
  0xd1   : > { %1954 = vmatprep.subr.mxu0 %v2459_v0 }
  0xd2   : > { %1955 = vmatpush3.msra.mxu0 %v876_v12  ;;  %v1455_v12 = vld [vmem:[#allocation14] sm:$0xff] }
  0xd3   : > { %1956 = vmatprep.subr.mxu0 %v2459_v0 }
  0xd4   : > { %1957 = vmatpush3.msra.mxu0 %v875_v13  ;;  %v1452_v13 = vld [vmem:[#allocation13] sm:$0xff] }
  0xd5   : > { %1959 = vmatmul.mubr.msk.f32.vlgmr.msra.gmra.mxu0 %vm720_vm1, %v2840_v9  ;;  %1971 = vmatprep.subr.mxu0 %v2459_v0 }
  0xd6   : > { %1973 = vmatprep.mubr.msk.f32.mxu0 %vm2460_vm0, %v2459_v0 }
 0x189   : > { %v871_v16 = vpop.f32.mrf.mxu1 }
 0x18a   : > { %v872_v18 = vadd.f32 %v1863_v14, %v871_v16  ;;  %v1444_v14 = vld [vmem:[#allocation11] sm:$0xff] }
 0x18b   : > { %v1949_v20 = vpop.f32.mrf.mxu1 }
 0x18c   : > { %1122 = vrot.lane.b32.xlu0 %v872_v18, %s2461_s19  ;;  %1962 = vmatpush3.xpose.msk.msra.mxu1 %vm956_vm2, %v872_v18 }
 0x18d   : > { %v790_v17 = vpop.f32.mrf.mxu0  ;;  %1966 = vmatprep.subr.mxu1 %v2459_v0 }
 0x18e   : > { %v791_v19 = vadd.f32 %v1861_v15, %v790_v17  ;;  %v1445_v15 = vld [vmem:[%s3010_s9] sm:$0xff] }
 0x18f   : > { %v1938_v21 = vpop.f32.mrf.mxu0 }
 0x190   : > { %1964 = vmatmul.mubr.msk.f32.vlgmr.msra.gmra.mxu1 %vm956_vm2, %v791_v19  ;;  %1120 = vrot.lane.b32.xlu0 %v791_v19, %s2461_s19 }
 0x191   : > { %1968 = vmatprep.mubr.msk.f32.mxu1 %vm2460_vm0, %v2459_v0 }
 0x195   : > { %v952_v23 = vpop.f32.mrf.mxu0 }
 0x196   : > { %v953_v24 = vadd.f32 %v1865_v22, %v952_v23 }
 0x197   : > { %v1960_v25 = vpop.f32.mrf.mxu0 }
 0x198   : > { %1967 = vmatpush3.msra.mxu1 %v953_v24 }
 0x199   : > { %1976 = vmatprep.subr.mxu1 %v2459_v0 }
 0x1fe   : > { %v1123_v26 = vpop.permute.xlu0 %1122 }
 0x1ff   : > { %1972 = vmatpush3.xpose.msk.msra.mxu0 %vm956_vm2, %v1123_v26 }
 0x200   : > { %1981 = vmatprep.subr.mxu0 %v2459_v0 }
 0x202   : > { %v1121_v27 = vpop.permute.xlu0 %1120 }
 0x203   : > { %1974 = vmatmul.mubr.msk.f32.vlgmr.msra.gmra.mxu0 %vm956_vm2, %v1121_v27 }
 0x204   : > { %1989 = vmatprep.mubr.msk.f32.mxu0 %vm2460_vm0, %v2459_v0  ;;  %1982 = vmatpush3.msra.mxu0 %v1296_v56 }
 0x205   : > { %1983 = vmatprep.subr.mxu0 %v2459_v0 }
 0x206   : > { %1984 = vmatpush3.msra.mxu0 %v1295_v58  ;;  %v1882_v58 = vld [vmem:[%s3084_s7] ss:$0 sm:$0xff] }
 0x207   : > { %1985 = vmatprep.subr.mxu0 %v2459_v0 }
 0x208   : > { %1986 = vmatpush3.msra.mxu0 %v1294_v60 }
 0x209   : > { %1987 = vmatprep.subr.mxu0 %v2459_v0 }
 0x20a   : > { %1988 = vmatpush3.msra.mxu0 %v1293_v1 }
 0x20b   : > { %2003 = vmatprep.subr.mxu0 %v2459_v0 }
 0x250   : > { %v1029_v28 = vpop.f32.mrf.mxu1 }
 0x251   : > { %v1033_v30 = vmul.f32 0.25, %v1029_v28 }
 0x252   : > { %v1965_v31 = vpop.f32.mrf.mxu1 }
 0x253   : > { %v1034_v32 = vadd.f32 %v1033_v30, %v708_v29 }
 0x255   : > { %v1036_v33 = vsel %vm1035_vm3, %v1034_v32, -inf }
 0x256   : > { %1037 = vmax.xlane.f32.xlu1 %v1036_v33 }
 0x2c3   : > { %v1194_v34 = vpop.f32.mrf.mxu0 }
 0x2c4   : > { %v1198_v35 = vmul.f32 0.25, %v1194_v34 }
 0x2c5   : > { %v1975_v36 = vpop.f32.mrf.mxu0 }
 0x2c6   : > { %v1199_v37 = vadd.f32 %v1198_v35, %v708_v29 }
 0x2c8   : > { %v1200_v38 = vsel %vm1035_vm3, %v1199_v37, -inf }
 0x2c9   : > { %1201 = vmax.xlane.f32.xlu1 %v1200_v38 }
 0x2df   : > { %v1038_v39 = vpop.xlane.xlu1 %1037 }
 0x2e0   : > { %v1039_v40 = vsub.f32 %v1034_v32, %v1038_v39 }
 0x2e2   : > { %v1040_v41 = vmul.f32 1.442695, %v1039_v40 }
 0x2e4   : > { %2139 = vpow2.f32 %v1040_v41  ;;  %v1879_v41 = vld [vmem:[%s3015_s14] ss:$0 sm:$0xff] }
 0x2f1   : > { %v2140_v42 = vpop.eup %2139 }
 0x2f2   : > { %v1042_v43 = vsel %vm1035_vm3, %v2140_v42, 0.0 }
 0x2f3   : > { %1043 = vadd.xlane.f32.xlu0 %v1042_v43  ;;  %v1880_v43 = vld [vmem:[%s3016_s15] ss:$0 sm:$0xff] }
 0x352   : > { %v1202_v44 = vpop.xlane.xlu1 %1201 }
 0x353   : > { %v1203_v45 = vsub.f32 %v1199_v37, %v1202_v44 }
 0x355   : > { %v1204_v46 = vmul.f32 1.442695, %v1203_v45 }
 0x357   : > { %2141 = vpow2.f32 %v1204_v46 }
 0x364   : > { %v2142_v47 = vpop.eup %2141 }
 0x365   : > { %v1206_v48 = vsel %vm1035_vm3, %v2142_v47, 0.0 }
 0x366   : > { %1207 = vadd.xlane.f32.xlu1 %v1206_v48 }
 0x377   : > { %1212 = vrot.lane.b32.xlu1 %v953_v24, %s2461_s19  ;;  %s706_s19 = scalar_lea.vmem [#allocation16], %s2774_s23 }
 0x37c   : > { %v1044_v49 = vpop.xlane.xlu0 %1043 }
 0x37d   : > { %2143 = vrcp.f32 %v1044_v49 }
 0x38a   : > { %v2144_v50 = vpop.eup %2143 }
 0x38b   : > { %v1046_v51 = vmul.f32 %v2144_v50, %v2140_v42 }
 0x38d   : > { %1969 = vmatmul.mubr.msk.f32.vlgmr.msra.gmra.mxu1 %vm1035_vm3, %v1046_v51 }
 0x38e   : > { %1978 = vmatprep.mubr.msk.f32.mxu1 %vm2460_vm0, %v2459_v0 }
 0x3ef   : > { %v1208_v52 = vpop.xlane.xlu1 %1207 }
 0x3f0   : > { %2145 = vrcp.f32 %v1208_v52 }
 0x3f3   : > { %v1213_v53 = vpop.permute.xlu1 %1212 }
 0x3f4   : > { %1977 = vmatpush3.msra.mxu1 %v1213_v53 }
 0x3f5   : > { %1992 = vmatprep.subr.mxu1 %v2459_v0 }
 0x3fd   : > { %v2146_v54 = vpop.eup %2145 }
 0x3fe   : > { %v1210_v55 = vmul.f32 %v2146_v54, %v2142_v47 }
 0x400   : > { %1979 = vmatmul.mubr.msk.f32.vlgmr.msra.gmra.mxu1 %vm1035_vm3, %v1210_v55 }
 0x401   : > { %2000 = vmatprep.mubr.msk.f32.mxu1 %vm2460_vm0, %v2459_v0  ;;  %1993 = vmatpush3.msra.mxu1 %v1373_v57 }
 0x402   : > { %1994 = vmatprep.subr.mxu1 %v2459_v0 }
 0x403   : > { %1995 = vmatpush3.msra.mxu1 %v1372_v59 }
 0x404   : > { %1996 = vmatprep.subr.mxu1 %v2459_v0 }
 0x405   : > { %1997 = vmatpush3.msra.mxu1 %v1371_v61 }
 0x406   : > { %1998 = vmatprep.subr.mxu1 %v2459_v0 }
 0x407   : > { %1999 = vmatpush3.msra.mxu1 %v1370_v2 }
 0x408   : > { %2012 = vmatprep.subr.mxu1 %v2459_v0 }
 0x44d   : > { %v1116_v62 = vpop.f32.mrf.mxu1 }
 0x44f   : > { %v1970_v63 = vpop.f32.mrf.mxu1 }
 0x4c0   : > { %v1284_v3 = vpop.f32.mrf.mxu1 }
 0x4c1   : > { %1289 = vrot.lane.b32.xlu1 %v1284_v3, %s2462_s3  ;;  %s1688_s3 = sshll.u32 %s706_s19, 4  ;;  %s1689_s3 = int_to_ptr.vmem [resolvable:$true] %s1688_s3 }
 0x4c2   : > { %v1980_v4 = vpop.f32.mrf.mxu1  ;;  %s2363_s27 = scalar_lea.vmem %s1689_s3, 128  ;;  %p2370_p9 = scmp.lt.s32.totalorder %s1689_s3, %s2368_s0 }
 0x4c3   : > { %p2364_p8 = scmp.ne.s32.totalorder %s1689_s3, %s2363_s27  ;;  %p2371_p7 = scmp.lt.s32.totalorder %s2369_s1, %s2363_s27 }
 0x4c5   : > { %p2365_p1 = pnand %p2364_p8, %p3086_p10  ;;  %p2372_p6 = por %p2371_p7, %p2370_p9 }
 0x4c7   : > { %p2366_p4 = pneg %p2365_p1 }
 0x4c9   : > { %p2373_p3 = pnand %p2372_p6, %p2366_p4 }
 0x533   : > { %v1290_v5 = vpop.permute.xlu1 %1289 }
 0x534   : > { %v1292_v6 = vsel %vm956_vm2, %v1116_v62, %v1290_v5 }
 0x535   : > { %1990 = vmatmul.mubr.msk.f32.vlgmr.msra.gmra.mxu0 %vm720_vm1, %v1292_v6  ;;  %2001 = vmatmul.mubr.msk.f32.vlgmr.msra.gmra.mxu1 %vm720_vm1, %v1292_v6 }
 0x536   : > { %2009 = vmatprep.mubr.msk.f32.mxu0 %vm2460_vm0, %v2459_v0  ;;  %2018 = vmatprep.mubr.msk.f32.mxu1 %vm2460_vm0, %v2459_v0 }
 0x537   : > { %2004 = vmatpush3.msk.msra.mxu0 %vm1462_vm4, %v1457_v7  ;;  %2013 = vmatpush3.msk.msra.mxu1 %vm1462_vm4, %v1454_v8 }
 0x538   : > { %2005 = vmatprep.subr.mxu0 %v2459_v0  ;;  %2014 = vmatprep.subr.mxu1 %v2459_v0 }
 0x539   : > { %2006 = vmatpush3.msra.mxu0 %v1456_v10  ;;  %2015 = vmatpush3.msra.mxu1 %v1453_v11 }
 0x53a   : > { %2007 = vmatprep.subr.mxu0 %v2459_v0  ;;  %2016 = vmatprep.subr.mxu1 %v2459_v0 }
 0x53b   : > { %2008 = vmatpush3.msra.mxu0 %v1455_v12  ;;  %2017 = vmatpush3.msra.mxu1 %v1452_v13 }
 0x5f5   : > { %v1366_v16 = vpop.f32.mrf.mxu0  ;;  %v1440_v17 = vpop.f32.mrf.mxu1 }
 0x5f6   : > { %v1446_v18 = vmul.f32 %v1444_v14, %v1366_v16  ;;  %v1449_v19 = vmul.f32 %v1445_v15, %v1366_v16  ;;  %v1447_v20 = vmul.f32 %v1445_v15, %v1440_v17  ;;  %v1450_v21 = vmul.f32 %v1444_v14, %v1440_v17 }
 0x5f7   : > { %v1991_v22 = vpop.f32.mrf.mxu0  ;;  %v2002_v23 = vpop.f32.mrf.mxu1 }
 0x5f8   : > { %v1448_v24 = vsub.f32 %v1446_v18, %v1447_v20  ;;  %v1451_v0 = vadd.f32 %v1450_v21, %v1449_v19 }
 0x5fa   : > { %2010 = vmatmul.mubr.msk.f32.vlgmr.msra.gmra.mxu0 %vm1458_vm5, %v1451_v0  ;;  %2019 = vmatmul.mubr.msk.f32.vlgmr.msra.gmra.mxu1 %vm1458_vm5, %v1448_v24 }
 0x6ba   : > { %v1532_v25 = vpop.f32.mrf.mxu0  ;;  %v1608_v26 = vpop.f32.mrf.mxu1 }
 0x6bb   : > { %v1609_v27 = vadd.f32 %v1608_v26, %v1532_v25 }
 0x6bc   : > { %v2011_v28 = vpop.f32.mrf.mxu0  ;;  %v2020_v29 = vpop.f32.mrf.mxu1 }
 0x6bd   : > { %v1612_v30 = vadd.f32 %v1609_v27, %v1292_v6 }
 0x6bf   : > { %v1615_v31 = vsel %vm720_vm1, %v1612_v30, 0.0 }
 0x6c0   : > { %1616 = vadd.xlane.f32.xlu1 %v1615_v31 }
 0x749   : > { %v1617_v32 = vpop.xlane.xlu1 %1616 }
 0x74a   : > { %v1619_v33 = vmul.f32 0.03125, %v1617_v32 }
 0x74c   : > { %v1620_v34 = vsub.f32 %v1612_v30, %v1619_v33 }
 0x74e   : > { %v1621_v35 = vmul.f32 %v1620_v34, %v1620_v34 }
 0x750   : > { %v1622_v36 = vsel %vm720_vm1, %v1621_v35, 0.0 }
 0x751   : > { %1623 = vadd.xlane.f32.xlu0 %v1622_v36 }
 0x7da   : > { %v1624_v37 = vpop.xlane.xlu0 %1623 }
 0x7db   : > { %v1625_v38 = vmul.f32 0.03125, %v1624_v37 }
 0x7dd   : > { %v1626_v39 = vadd.f32 1e-12, %v1625_v38 }
 0x7df   : > { %2147 = vrsqrt.f32 %v1626_v39 }
 0x7ec   : > { %v2148_v40 = vpop.eup %2147 }
 0x7ed   : > { %v1628_v42 = vmul.f32 %v2148_v40, %v1620_v34 }
 0x7ef   : > { %v1635_v44 = vmul.f32 %v1879_v41, %v1628_v42 }
 0x7f1   : > { %v1642_v45 = vadd.f32 %v1880_v43, %v1635_v44 }
 0x7f3   : > { %v1643_v46 = vadd.f32 %v1642_v45, %v2840_v9  ;;  %v1881_v9 = vld [vmem:[%s3083_s29] ss:$0 sm:$0xff] }
 0x7f5   : > { %v1646_v47 = vsel %vm720_vm1, %v1643_v46, 0.0 }
 0x7f6   : > { %1647 = vadd.xlane.f32.xlu0 %v1646_v47 }
 0x87f   : > { %v1648_v48 = vpop.xlane.xlu0 %1647 }
 0x880   : > { %v1649_v49 = vmul.f32 0.03125, %v1648_v48 }
 0x882   : > { %v1650_v50 = vsub.f32 %v1643_v46, %v1649_v49 }
 0x884   : > { %v1651_v51 = vmul.f32 %v1650_v50, %v1650_v50 }
 0x886   : > { %v1652_v52 = vsel %vm720_vm1, %v1651_v51, 0.0 }
 0x887   : > { %1653 = vadd.xlane.f32.xlu0 %v1652_v52 }
 0x910   : > { %v1654_v53 = vpop.xlane.xlu0 %1653 }
 0x911   : > { %v1655_v54 = vmul.f32 0.03125, %v1654_v53 }
 0x913   : > { %v1656_v55 = vadd.f32 1e-12, %v1655_v54 }
 0x915   : > { %2149 = vrsqrt.f32 %v1656_v55 }
 0x922   : > { %v2150_v56 = vpop.eup %2149 }
 0x923   : > { %v1658_v57 = vmul.f32 %v2150_v56, %v1650_v50 }
 0x925   : > { %v1665_v59 = vmul.f32 %v1881_v9, %v1658_v57 }
 0x927   : > { %v1672_v60 = vadd.f32 %v1882_v58, %v1665_v59 }
 0x929   : > { %1673 = vst.msk [vmem:[%s706_s19] sm:$0xff] %vm720_vm1, %v1672_v60 }
 0x92a   : > { %2376 = shalt.err (!%p2373_p3)
}
 0x92b   : > { %s2377_s23 = scalar_lea.hbm %s1686_s20, 128  ;;  %s2381_s18 = scalar_lea.hbm %s3085_s12, 256 }
 0x92c   : > { %p2378_p11 = scmp.ne.s32.totalorder %s1686_s20, %s2377_s23  ;;  %p2382_p0 = scmp.lt.s32.totalorder %s1686_s20, %s3085_s12 }
 0x92d   : > { %p2383_p2 = scmp.lt.s32.totalorder %s2381_s18, %s2377_s23 }
 0x92e   : > { %p2379_p12 = pnand %p2378_p11, %p3086_p10 }
 0x92f   : > { %p2384_p5 = por %p2383_p2, %p2382_p0 }
 0x930   : > { %p2380_p13 = pneg %p2379_p12 }
 0x932   : > { %p2385_p8 = pnand %p2384_p5, %p2380_p13 }
 0x934   : > { %2388 = shalt.err (!%p2385_p8)
}
 0x935   : > { %2049 = dma.vmem_to_hbm [thread:$0]  (%p3086_p10), %s1689_s3, 128, %s1686_s20, %s1675_s25  }
 0x936 PF: > { %s3087_s8 = sld [smem:[#allocation24_spill]]  ;;  %p3090_p4 = scmp.ge.s32.totalorder %s2447_s30, 2 }
 0x937   : > { %s3088_s19 = sld [smem:[#allocation29_spill]] }
 0x93c   : > { %s1700_s17 = sand.u32 1, %s3087_s8  }
 0x93d   : > { %p3089_p1 = scmp.ne.s32.totalorder %s3088_s19, 0  ;;  %s1701_s16 = scalar_lea.sflag [#allocation4], %s1700_s17 }
 0x93f   : > { %p2078_p9 = pnand %p3090_p4, %p3089_p1 }
 0x941   : > { %p2079_p7 = pneg %p2078_p9 }
 0x943   : > { %2430 = dma.done.wait (%p2079_p7), %s1701_s16, 128  }
 0x944   : > { %2432 = vsyncadd (%p2079_p7), %s1701_s16, 4294967168  ;;  %s3091_s30 = sld [smem:[#allocation26_spill]]  ;;  %s3094_s27 = smov %s2439_s28 }
 0x945   : > { %s3092_s26 = sld [smem:[#allocation25_spill]] }
 0x946   : > { %s3093_s29 = sld [smem:[#allocation27_spill]] }
 0x94a   : > { %p37_p6 = scmp.ge.s32.totalorder %s3091_s30, 4  }
 0x94b   : > { %s3095_s28 = smov %s3092_s26 }
 0x94c   :  { %39 = sbr.rel (!%p37_p6) target bundleno = 23 (0x17), region = 174 }
 0x951   :  { %1706 = vsyncpa [#allocation3], 1 }
 0x952   :  { %1708 = vsyncpa [#allocation3 + $0x1], 1 }
 0x953   :  { %1709 = vsyncpa [#allocation6], 1 }
 0x954   :  { %1711 = vsyncpa [#allocation6 + $0x1], 1 }
 0x955   :  { %1712 = vsyncpa [#allocation9], 1 }
 0x956   :  { %1713 = vsyncpa [#allocation12], 1 }
 0x957   :  { %1714 = vsyncpa [#allocation15], 1 }
 0x958   :  { %1715 = vsyncpa [#allocation4], 1 }
 0x959   :  { %1717 = vsyncpa [#allocation4 + $0x1], 1 }

</bundles_post_ra>
